<compile_context>
chip_gen: v5e
topology: v5e:2x2
jax: 0.10.0
libtpu: 0.0.40
codegen_flags: <defaults>
</compile_context>

<pallas_src>
import jax
import jax.numpy as jnp
from jax.experimental import pallas as pl
from jax.experimental.pallas import tpu as pltpu


def mlp_kernel(x_ref, w1_ref, b1_ref, w2_ref, b2_ref, w3_ref, b3_ref, o_ref):
    # x tile: [TB, 784] streamed from HBM (bf16 preferred); cast is a no-op
    # when the producer already emits bf16.
    x = x_ref[...].astype(jnp.bfloat16)

    # fc1 + ReLU  (bf16 x bf16 -> f32 accumulate on the MXU)
    h1 = jnp.dot(x, w1_ref[...], preferred_element_type=jnp.float32) + b1_ref[...]
    h1 = jnp.maximum(h1, 0.0)                                          # [TB, 256] f32

    # Dropout(p=0.3): eval-mode semantics -> identity.
    # TODO(synk): training-mode dropout would use pltpu.prng_seed +
    #             pltpu.stateful_bernoulli; not implemented here.

    # fc2 + ReLU
    h2 = jnp.dot(h1.astype(jnp.bfloat16), w2_ref[...],
                 preferred_element_type=jnp.float32) + b2_ref[...]
    h2 = jnp.maximum(h2, 0.0)                                          # [TB, 128] f32

    # fc3
    logits = jnp.dot(h2.astype(jnp.bfloat16), w3_ref[...],
                     preferred_element_type=jnp.float32) + b3_ref[...]  # [TB, 10] f32

    # log_softmax along dim=1 (numerically stable, all f32)
    m = jnp.max(logits, axis=1, keepdims=True)
    lse = m + jnp.log(jnp.sum(jnp.exp(logits - m), axis=1, keepdims=True))
    o_ref[...] = (logits - lse).astype(o_ref.dtype)


def _round_up(n, m):
    return ((n + m - 1) // m) * m


def _device_kind():
    try:
        return jax.devices()[0].device_kind.lower()
    except Exception:
        return ""


def ann_classifier_forward(x, params, *, tb=None):
    """x: [B, 1, 28, 28] float32 or bfloat16 (NCHW). Returns log-probs [B, 10] f32."""
    w1, b1, w2, b2, w3, b3 = params
    B = x.shape[0]
    # x.view(-1, 784); keep the producer's dtype — no wrapper-side cast, the
    # kernel casts (for free) if the producer still emits f32.
    x2d = x.reshape(B, 28 * 28)

    kind = _device_kind()
    if tb is None:
        # v5e: 16 MiB default scoped VMEM -> keep TB <= 1024 with f32 x.
        # v6e/v7x: 32 MiB scoped default -> TB = 2048 fits (f32 or bf16 x).
        tb = 1024 if ("v5" in kind or not kind) else 2048

    TB = min(tb, _round_up(B, 8))
    # v7x has 2 TensorCores: make sure mid/large batches produce >= 2 grid
    # tiles so the "parallel" batch axis can be split across both cores.
    # TODO(synk): verify "parallel" dimension_semantics actually shards across
    #             v7x TCs; fall back to core_map/CORE_PARALLEL if it does not.
    if "v7" in kind and B > 256 and pl.cdiv(B, TB) < 2:
        TB = max(256, _round_up(pl.cdiv(B, 2), 8))

    grid = (pl.cdiv(B, TB),)  # last tile clamped by Pallas; no jnp.pad copy

    def resident_spec(shape):
        # Constant index_map => block revisited every step; single-buffer it.
        nd = len(shape)
        return pl.BlockSpec(shape, lambda i: (0,) * nd,
                            pipeline_mode=pl.Buffered(1))

    flops = 2 * B * (784 * 256 + 256 * 128 + 128 * 10)
    bytes_accessed = (
        B * 784 * x2d.dtype.itemsize
        + sum(int(a.size) * a.dtype.itemsize for a in (w1, b1, w2, b2, w3, b3))
        + B * 10 * 4
    )
    cost = pl.CostEstimate(flops=flops, transcendentals=11 * B,
                           bytes_accessed=bytes_accessed)

    out = pl.pallas_call(
        mlp_kernel,
        out_shape=jax.ShapeDtypeStruct((B, 10), jnp.float32),
        grid=grid,
        in_specs=[
            pl.BlockSpec((TB, 28 * 28), lambda i: (i, 0)),  # x streamed per tile
            resident_spec(w1.shape),                        # W1 [784, 256] bf16
            resident_spec(b1.shape),                        # b1 [1, 256]   f32
            resident_spec(w2.shape),                        # W2 [256, 128] bf16
            resident_spec(b2.shape),                        # b2 [1, 128]   f32
            resident_spec(w3.shape),                        # W3 [128, 10]  bf16
            resident_spec(b3.shape),                        # b3 [1, 10]    f32
        ],
        out_specs=pl.BlockSpec((TB, 10), lambda i: (i, 0)),
        compiler_params=pltpu.CompilerParams(
            dimension_semantics=("parallel",),
        ),
        cost_estimate=cost,
    )(x2d, w1, b1, w2, b2, w3, b3)

    return out


def init_params(key):
    """Init matching PyTorch nn.Linear default U[-1/sqrt(fan_in), +1/sqrt(fan_in)].
    Weights stored as (in_features, out_features) bf16 for the kernel's x @ W
    layout; biases kept f32 with shape (1, out_features)."""
    def linear(key, fan_in, fan_out):
        kw, kb = jax.random.split(key)
        bound = 1.0 / (fan_in ** 0.5)
        w = jax.random.uniform(kw, (fan_in, fan_out), jnp.float32, -bound, bound)
        b = jax.random.uniform(kb, (1, fan_out), jnp.float32, -bound, bound)
        return w.astype(jnp.bfloat16), b

    k1, k2, k3 = jax.random.split(key, 3)
    w1, b1 = linear(k1, 28 * 28, 256)
    w2, b2 = linear(k2, 256, 128)
    w3, b3 = linear(k3, 128, 10)
    return (w1, b1, w2, b2, w3, b3)


def reference_forward(x, params):
    """Pure-JAX reference using the same bf16-matmul / f32-accumulate recipe."""
    w1, b1, w2, b2, w3, b3 = params
    h = x.reshape(x.shape[0], -1).astype(jnp.bfloat16)
    h = jnp.maximum(jnp.dot(h, w1, preferred_element_type=jnp.float32) + b1, 0.0)
    h = jnp.maximum(
        jnp.dot(h.astype(jnp.bfloat16), w2, preferred_element_type=jnp.float32) + b2, 0.0)
    logits = jnp.dot(h.astype(jnp.bfloat16), w3, preferred_element_type=jnp.float32) + b3
    return jax.nn.log_softmax(logits, axis=1)


if __name__ == "__main__":
    key = jax.random.PRNGKey(0)
    kx, kp = jax.random.split(key)
    params = init_params(kp)

    # Test 1: small batch, bf16 producer (the preferred, HBM-halved x stream).
    batch = 8
    x = jax.random.normal(kx, (batch, 1, 28, 28), jnp.float32).astype(jnp.bfloat16)
    out = jax.block_until_ready(ann_classifier_forward(x, params))
    ref = reference_forward(x, params)
    assert out.shape == (batch, 10)
    assert bool(jnp.allclose(out, ref, atol=2e-3, rtol=2e-3)), \
        "mismatch vs pure-JAX reference (bf16 x)"

    # Test 2: ragged batch with f32 x and a small tile override so the grid has
    # a full tile plus a clamped partial tile (exercises the no-pad ragged path).
    batch2 = 13
    x2 = jax.random.normal(kx, (batch2, 1, 28, 28), jnp.float32)
    out2 = jax.block_until_ready(ann_classifier_forward(x2, params, tb=8))
    ref2 = reference_forward(x2, params)
    assert out2.shape == (batch2, 10)
    assert bool(jnp.all(jnp.isfinite(out2))), "non-finite values leaked from padded rows"
    assert bool(jnp.allclose(out2, ref2, atol=2e-3, rtol=2e-3)), \
        "mismatch on ragged batch (f32 x, partial last tile)"

    print("KERNEL_OK")
</pallas_src>

<mosaic_0001>
module attributes {stable_mosaic.version = 11 : i64} {
  func.func @mlp_kernel(%arg0: i32, %arg1: memref<8x784xbf16, #tpu.memory_space<vmem>>, %arg2: memref<784x256xbf16, #tpu.memory_space<vmem>>, %arg3: memref<1x256xf32, #tpu.memory_space<vmem>>, %arg4: memref<256x128xbf16, #tpu.memory_space<vmem>>, %arg5: memref<1x128xf32, #tpu.memory_space<vmem>>, %arg6: memref<128x10xbf16, #tpu.memory_space<vmem>>, %arg7: memref<1x10xf32, #tpu.memory_space<vmem>>, %arg8: memref<8x10xf32, #tpu.memory_space<vmem>>) attributes {dimension_semantics = [#tpu.dimension_semantics<parallel>], iteration_bounds = array<i64: 1>, scalar_prefetch = 0 : i64, scratch_operands = 0 : i64, tpu.core_type = #tpu.core_type<tc>, window_params = [{transform_indices = @transform_0, window_bounds = array<i64: 8, 784>}, {pipeline_mode = #tpu.pipeline_mode<synchronous>, transform_indices = @transform_1, window_bounds = array<i64: 784, 256>}, {pipeline_mode = #tpu.pipeline_mode<synchronous>, transform_indices = @transform_2, window_bounds = array<i64: 1, 256>}, {pipeline_mode = #tpu.pipeline_mode<synchronous>, transform_indices = @transform_3, window_bounds = array<i64: 256, 128>}, {pipeline_mode = #tpu.pipeline_mode<synchronous>, transform_indices = @transform_4, window_bounds = array<i64: 1, 128>}, {pipeline_mode = #tpu.pipeline_mode<synchronous>, transform_indices = @transform_5, window_bounds = array<i64: 128, 10>}, {pipeline_mode = #tpu.pipeline_mode<synchronous>, transform_indices = @transform_6, window_bounds = array<i64: 1, 10>}, {transform_indices = @transform_7, window_bounds = array<i64: 8, 10>}]} {
    %c0 = arith.constant 0 : index
    %c0_0 = arith.constant 0 : index
    %0 = vector.load %arg1[%c0, %c0_0] : memref<8x784xbf16, #tpu.memory_space<vmem>>, vector<8x784xbf16>
    %c0_1 = arith.constant 0 : index
    %c0_2 = arith.constant 0 : index
    %1 = vector.load %arg2[%c0_1, %c0_2] : memref<784x256xbf16, #tpu.memory_space<vmem>>, vector<784x256xbf16>
    %cst = arith.constant dense<0.000000e+00> : vector<8x256xf32>
    %2 = tpu.matmul %0, %1, %cst {dimension_numbers = #tpu.dot_dimension_numbers<[1], [0], [0], [1], [0, 0, 1, 1], [], []>} : vector<8x784xbf16>, vector<784x256xbf16>, vector<8x256xf32> -> vector<8x256xf32>
    %c0_3 = arith.constant 0 : index
    %c0_4 = arith.constant 0 : index
    %3 = vector.load %arg3[%c0_3, %c0_4] : memref<1x256xf32, #tpu.memory_space<vmem>>, vector<1x256xf32>
    %4 = vector.broadcast %3 : vector<1x256xf32> to vector<8x256xf32>
    %5 = arith.addf %2, %4 : vector<8x256xf32>
    %cst_5 = arith.constant 0.000000e+00 : f32
    %6 = vector.broadcast %cst_5 : f32 to vector<8x256xf32>
    %7 = arith.maximumf %5, %6 : vector<8x256xf32>
    %8 = arith.truncf %7 : vector<8x256xf32> to vector<8x256xbf16>
    %c0_6 = arith.constant 0 : index
    %c0_7 = arith.constant 0 : index
    %9 = vector.load %arg4[%c0_6, %c0_7] : memref<256x128xbf16, #tpu.memory_space<vmem>>, vector<256x128xbf16>
    %cst_8 = arith.constant dense<0.000000e+00> : vector<8x128xf32>
    %10 = tpu.matmul %8, %9, %cst_8 {dimension_numbers = #tpu.dot_dimension_numbers<[1], [0], [0], [1], [0, 0, 1, 1], [], []>} : vector<8x256xbf16>, vector<256x128xbf16>, vector<8x128xf32> -> vector<8x128xf32>
    %c0_9 = arith.constant 0 : index
    %c0_10 = arith.constant 0 : index
    %11 = vector.load %arg5[%c0_9, %c0_10] : memref<1x128xf32, #tpu.memory_space<vmem>>, vector<1x128xf32>
    %12 = vector.broadcast %11 : vector<1x128xf32> to vector<8x128xf32>
    %13 = arith.addf %10, %12 : vector<8x128xf32>
    %cst_11 = arith.constant 0.000000e+00 : f32
    %14 = vector.broadcast %cst_11 : f32 to vector<8x128xf32>
    %15 = arith.maximumf %13, %14 : vector<8x128xf32>
    %16 = arith.truncf %15 : vector<8x128xf32> to vector<8x128xbf16>
    %c0_12 = arith.constant 0 : index
    %c0_13 = arith.constant 0 : index
    %17 = vector.load %arg6[%c0_12, %c0_13] : memref<128x10xbf16, #tpu.memory_space<vmem>>, vector<128x10xbf16>
    %cst_14 = arith.constant dense<0.000000e+00> : vector<8x10xf32>
    %18 = tpu.matmul %16, %17, %cst_14 {dimension_numbers = #tpu.dot_dimension_numbers<[1], [0], [0], [1], [0, 0, 1, 1], [], []>} : vector<8x128xbf16>, vector<128x10xbf16>, vector<8x10xf32> -> vector<8x10xf32>
    %c0_15 = arith.constant 0 : index
    %c0_16 = arith.constant 0 : index
    %19 = vector.load %arg7[%c0_15, %c0_16] : memref<1x10xf32, #tpu.memory_space<vmem>>, vector<1x10xf32>
    %20 = vector.broadcast %19 : vector<1x10xf32> to vector<8x10xf32>
    %21 = arith.addf %18, %20 : vector<8x10xf32>
    %cst_17 = arith.constant dense<0xFF800000> : vector<8xf32>
    %22 = vector.multi_reduction <maximumf>, %21, %cst_17 [1] : vector<8x10xf32> to vector<8xf32>
    %23 = vector.shape_cast %22 : vector<8xf32> to vector<8x1xf32>
    %24 = vector.broadcast %23 : vector<8x1xf32> to vector<8x10xf32>
    %25 = arith.subf %21, %24 : vector<8x10xf32>
    %26 = math.exp %25 : vector<8x10xf32>
    %cst_18 = arith.constant dense<0.000000e+00> : vector<8xf32>
    %27 = vector.multi_reduction <add>, %26, %cst_18 [1] : vector<8x10xf32> to vector<8xf32>
    %28 = vector.shape_cast %27 : vector<8xf32> to vector<8x1xf32>
    %29 = math.log %28 : vector<8x1xf32>
    %30 = arith.addf %23, %29 : vector<8x1xf32>
    %31 = vector.broadcast %30 : vector<8x1xf32> to vector<8x10xf32>
    %32 = arith.subf %21, %31 : vector<8x10xf32>
    %c0_19 = arith.constant 0 : index
    %c0_20 = arith.constant 0 : index
    %33 = vector.load %arg8[%c0_19, %c0_20] : memref<8x10xf32, #tpu.memory_space<vmem>>, vector<8x10xf32>
    tpu.vector_store %arg8[%c0_19, %c0_20], %32 {strides = array<i32>} : memref<8x10xf32, #tpu.memory_space<vmem>>, vector<8x10xf32>,
    return
  }
  func.func @transform_0(%arg0: i32) -> (i32, i32) {
    %c0_i32 = arith.constant 0 : i32
    %c0_i32_0 = arith.constant 0 : i32
    return %arg0, %c0_i32 : i32, i32
  }
  func.func @transform_1(%arg0: i32) -> (i32, i32) {
    %c0_i32 = arith.constant 0 : i32
    %c0_i32_0 = arith.constant 0 : i32
    %c0_i32_1 = arith.constant 0 : i32
    return %c0_i32, %c0_i32_0 : i32, i32
  }
  func.func @transform_2(%arg0: i32) -> (i32, i32) {
    %c0_i32 = arith.constant 0 : i32
    %c0_i32_0 = arith.constant 0 : i32
    %c0_i32_1 = arith.constant 0 : i32
    return %c0_i32, %c0_i32_0 : i32, i32
  }
  func.func @transform_3(%arg0: i32) -> (i32, i32) {
    %c0_i32 = arith.constant 0 : i32
    %c0_i32_0 = arith.constant 0 : i32
    %c0_i32_1 = arith.constant 0 : i32
    return %c0_i32, %c0_i32_0 : i32, i32
  }
  func.func @transform_4(%arg0: i32) -> (i32, i32) {
    %c0_i32 = arith.constant 0 : i32
    %c0_i32_0 = arith.constant 0 : i32
    %c0_i32_1 = arith.constant 0 : i32
    return %c0_i32, %c0_i32_0 : i32, i32
  }
  func.func @transform_5(%arg0: i32) -> (i32, i32) {
    %c0_i32 = arith.constant 0 : i32
    %c0_i32_0 = arith.constant 0 : i32
    %c0_i32_1 = arith.constant 0 : i32
    return %c0_i32, %c0_i32_0 : i32, i32
  }
  func.func @transform_6(%arg0: i32) -> (i32, i32) {
    %c0_i32 = arith.constant 0 : i32
    %c0_i32_0 = arith.constant 0 : i32
    %c0_i32_1 = arith.constant 0 : i32
    return %c0_i32, %c0_i32_0 : i32, i32
  }
  func.func @transform_7(%arg0: i32) -> (i32, i32) {
    %c0_i32 = arith.constant 0 : i32
    %c0_i32_0 = arith.constant 0 : i32
    return %arg0, %c0_i32 : i32, i32
  }
}

</mosaic_0001>

<bundles_post_ra>
// kernel: tpu_custom_call.1
= control target key start
LH: loop header
LB: loop body
LE: loop exit
PB: predicated region body
PF: predicated region fallthrough
CT: control target
= control target key end

     0   :  { %12 = vsyncpa [#allocation3], 0  ;;  %s1983_s0 = inlined_call_operand.vmem [shape: bf16[8,784], index: 0, kind: input, shape index: {}]   ;;  %s1984_s1 = inlined_call_operand.hbm [shape: bf16[784,256], index: 1, kind: input, shape index: {}]   ;;  %s1985_s2 = inlined_call_operand.vmem [shape: f32[1,256], index: 2, kind: input, shape index: {}]   ;;  %s1986_s3 = inlined_call_operand.hbm [shape: bf16[256,128], index: 3, kind: input, shape index: {}]   ;;  %s1987_s4 = inlined_call_operand.vmem [shape: f32[1,128], index: 4, kind: input, shape index: {}]   ;;  %s1988_s5 = inlined_call_operand.vmem [shape: bf16[128,10], index: 5, kind: input, shape index: {}]   ;;  %s1989_s6 = inlined_call_operand.vmem [shape: f32[1,10], index: 6, kind: input, shape index: {}]   ;;  %s1990_s7 = inlined_call_operand.hbm [shape: f32[8,10], index: 7, kind: output, shape index: {}]  }
   0x1   :  { %13 = vsyncpa [#allocation6], 0 }
   0x2   :  { %14 = vsyncpa [#allocation4], 0  ;;  %s21_s26 = sshll.u32 %s1984_s1, 4  ;;  %s1849_s27 = smov [#allocation2]   ;;  %s22_s26 = int_to_ptr.hbm [resolvable:$true] %s21_s26 }
   0x3   :  { %s23_s28 = sshll.u32 %s1849_s27, 4  ;;  %s36_s8 = sshll.u32 %s1986_s3, 4  ;;  %s24_s28 = int_to_ptr.vmem [resolvable:$true] %s23_s28  ;;  %s37_s8 = int_to_ptr.hbm [resolvable:$true] %s36_s8 }
   0x4   :  { %s1850_s9 = smov 128   ;;  %s1851_s10 = smov 8  }
   0x5   :  { %29 = dma.hbm_to_vmem [thread:$0]  %s22_s26, 12544, %s24_s28, [#allocation3], %s1850_s9, %s1850_s9, %s1851_s10  }
   0x6   :  { %s1852_s11 = smov [#allocation5]   ;;  %s1853_s13 = smov 64  }
   0x7   :  { %s38_s12 = sshll.u32 %s1852_s11, 4  ;;  %s1854_s14 = smov 4   ;;  %s39_s12 = int_to_ptr.vmem [resolvable:$true] %s38_s12 }
   0x8   :  { %44 = dma.hbm_to_vmem [thread:$0]  %s37_s8, 2048, %s39_s12, [#allocation6], %s1853_s13, %s1853_s13, %s1854_s14  }
   0x9   :  { %1843 = dma.done.wait [#allocation3], 12544  }
   0xa   :  { %1844 = vsyncadd [#allocation3], 4294954752 }
   0xb   :  { %1845 = dma.done.wait [#allocation6], 2048  }
   0xc   :  { %1846 = vsyncadd [#allocation6], 4294965248  ;;  %v1204_v0 = vld [vmem:[#allocation2 + $0x70] sm:$0xf]  ;;  %v1651_v1 = vld [vmem:[#allocation2 + $0x74] sm:$0xf0] }
   0xd   :  { %v1332_v2 = vld [vmem:[#allocation2 + $0x170] sm:$0xf]  ;;  %v1205_v3 = vor.u32 %v1651_v1, %v1204_v0  ;;  %v1683_v4 = vld [vmem:[#allocation2 + $0x174] sm:$0xf0]  ;;  %v1196_v11 = vld [vmem:[#allocation2 + $0x60] sm:$0xf] }
   0xe   :  { %v1396_v5 = vld [vmem:[#allocation2 + $0x1f0] sm:$0xf]  ;;  %v1699_v6 = vld [vmem:[#allocation2 + $0x1f4] sm:$0xf0]  ;;  %v1333_v7 = vor.u32 %v1683_v4, %v1332_v2  ;;  %v1649_v13 = vld [vmem:[#allocation2 + $0x64] sm:$0xf0] }
   0xf   :  { %v1397_v8 = vor.u32 %v1699_v6, %v1396_v5  ;;  %v1268_v9 = vld [vmem:[#allocation2 + $0xf0] sm:$0xf]  ;;  %v1667_v10 = vld [vmem:[#allocation2 + $0xf4] sm:$0xf0]  ;;  %686 = vmatpush.bf16.msra.mxu0 %v1205_v3  ;;  %v1324_v14 = vld [vmem:[#allocation2 + $0x160] sm:$0xf]  ;;  %v1197_v16 = vor.u32 %v1649_v13, %v1196_v11 }
  0x10   :  { %v1269_v12 = vor.u32 %v1667_v10, %v1268_v9  ;;  %v1681_v15 = vld [vmem:[#allocation2 + $0x164] sm:$0xf0]  ;;  %712 = vmatpush.bf16.msra.mxu2 %v1333_v7  ;;  %v1388_v18 = vld [vmem:[#allocation2 + $0x1e0] sm:$0xf]  ;;  %v1188_v23 = vld [vmem:[#allocation2 + $0x50] sm:$0xf] }
  0x11   :  { %725 = vmatpush.bf16.msra.mxu3 %v1397_v8  ;;  %v1325_v17 = vor.u32 %v1681_v15, %v1324_v14  ;;  %v1697_v19 = vld [vmem:[#allocation2 + $0x1e4] sm:$0xf0]  ;;  %v1260_v20 = vld [vmem:[#allocation2 + $0xe0] sm:$0xf]  ;;  %v1647_v24 = vld [vmem:[#allocation2 + $0x54] sm:$0xf0] }
  0x12   :  { %699 = vmatpush.bf16.msra.mxu1 %v1269_v12  ;;  %v1389_v21 = vor.u32 %v1697_v19, %v1388_v18  ;;  %v1665_v22 = vld [vmem:[#allocation2 + $0xe4] sm:$0xf0]  ;;  %v1316_v26 = vld [vmem:[#allocation2 + $0x150] sm:$0xf]  ;;  %v1679_v27 = vld [vmem:[#allocation2 + $0x154] sm:$0xf0]  ;;  %v1189_v29 = vor.u32 %v1647_v24, %v1188_v23 }
  0x13   :  { %v1261_v25 = vor.u32 %v1665_v22, %v1260_v20  ;;  %v1380_v28 = vld [vmem:[#allocation2 + $0x1d0] sm:$0xf]  ;;  %687 = vmatpush.bf16.msra.mxu0 %v1197_v16  ;;  %v1695_v30 = vld [vmem:[#allocation2 + $0x1d4] sm:$0xf0]  ;;  %v1317_v33 = vor.u32 %v1679_v27, %v1316_v26  ;;  %v1180_v35 = vld [vmem:[#allocation2 + $0x40] sm:$0xf] }
  0x14   :  { %v1252_v31 = vld [vmem:[#allocation2 + $0xd0] sm:$0xf]  ;;  %v1663_v32 = vld [vmem:[#allocation2 + $0xd4] sm:$0xf0]  ;;  %713 = vmatpush.bf16.msra.mxu2 %v1325_v17  ;;  %v1381_v34 = vor.u32 %v1695_v30, %v1380_v28  ;;  %v1645_v36 = vld [vmem:[#allocation2 + $0x44] sm:$0xf0] }
  0x15   :  { %726 = vmatpush.bf16.msra.mxu3 %v1389_v21  ;;  %v1308_v37 = vld [vmem:[#allocation2 + $0x140] sm:$0xf]  ;;  %v1253_v38 = vor.u32 %v1663_v32, %v1252_v31  ;;  %v1677_v39 = vld [vmem:[#allocation2 + $0x144] sm:$0xf0]  ;;  %v1181_v44 = vor.u32 %v1645_v36, %v1180_v35  ;;  %v1172_v47 = vld [vmem:[#allocation2 + $0x30] sm:$0xf] }
  0x16   :  { %700 = vmatpush.bf16.msra.mxu1 %v1261_v25  ;;  %v1372_v40 = vld [vmem:[#allocation2 + $0x1c0] sm:$0xf]  ;;  %v1693_v41 = vld [vmem:[#allocation2 + $0x1c4] sm:$0xf0]  ;;  %v1309_v45 = vor.u32 %v1677_v39, %v1308_v37  ;;  %v1643_v48 = vld [vmem:[#allocation2 + $0x34] sm:$0xf0] }
  0x17   :  { %v1244_v42 = vld [vmem:[#allocation2 + $0xc0] sm:$0xf]  ;;  %v1661_v43 = vld [vmem:[#allocation2 + $0xc4] sm:$0xf0]  ;;  %688 = vmatpush.bf16.msra.mxu0 %v1189_v29  ;;  %v1373_v46 = vor.u32 %v1693_v41, %v1372_v40  ;;  %v1300_v49 = vld [vmem:[#allocation2 + $0x130] sm:$0xf]  ;;  %v1173_v56 = vor.u32 %v1643_v48, %v1172_v47 }
  0x18   :  { %714 = vmatpush.bf16.msra.mxu2 %v1317_v33  ;;  %v1245_v50 = vor.u32 %v1661_v43, %v1244_v42  ;;  %v1675_v51 = vld [vmem:[#allocation2 + $0x134] sm:$0xf0]  ;;  %v1364_v52 = vld [vmem:[#allocation2 + $0x1b0] sm:$0xf]  ;;  %v1164_v59 = vld [vmem:[#allocation2 + $0x20] sm:$0xf] }
  0x19   :  { %727 = vmatpush.bf16.msra.mxu3 %v1381_v34  ;;  %v1691_v53 = vld [vmem:[#allocation2 + $0x1b4] sm:$0xf0]  ;;  %v1236_v54 = vld [vmem:[#allocation2 + $0xb0] sm:$0xf]  ;;  %v1301_v57 = vor.u32 %v1675_v51, %v1300_v49  ;;  %v1641_v60 = vld [vmem:[#allocation2 + $0x24] sm:$0xf0] }
  0x1a   :  { %701 = vmatpush.bf16.msra.mxu1 %v1253_v38  ;;  %v1659_v55 = vld [vmem:[#allocation2 + $0xb4] sm:$0xf0]  ;;  %v1365_v58 = vor.u32 %v1691_v53, %v1364_v52  ;;  %v1292_v61 = vld [vmem:[#allocation2 + $0x120] sm:$0xf]  ;;  %v1673_v63 = vld [vmem:[#allocation2 + $0x124] sm:$0xf0]  ;;  %v1165_v4 = vor.u32 %v1641_v60, %v1164_v59 }
  0x1b   :  { %689 = vmatpush.bf16.msra.mxu0 %v1181_v44  ;;  %v1237_v62 = vor.u32 %v1659_v55, %v1236_v54  ;;  %v1356_v0 = vld [vmem:[#allocation2 + $0x1a0] sm:$0xf]  ;;  %v1689_v1 = vld [vmem:[#allocation2 + $0x1a4] sm:$0xf0]  ;;  %v1293_v5 = vor.u32 %v1673_v63, %v1292_v61  ;;  %v1156_v7 = vld [vmem:[#allocation2 + $0x10] sm:$0xf] }
  0x1c   :  { %715 = vmatpush.bf16.msra.mxu2 %v1309_v45  ;;  %v1228_v2 = vld [vmem:[#allocation2 + $0xa0] sm:$0xf]  ;;  %v1657_v3 = vld [vmem:[#allocation2 + $0xa4] sm:$0xf0]  ;;  %v1357_v6 = vor.u32 %v1689_v1, %v1356_v0  ;;  %v1639_v8 = vld [vmem:[#allocation2 + $0x14] sm:$0xf0] }
  0x1d   :  { %728 = vmatpush.bf16.msra.mxu3 %v1373_v46  ;;  %v1284_v9 = vld [vmem:[#allocation2 + $0x110] sm:$0xf]  ;;  %v1229_v10 = vor.u32 %v1657_v3, %v1228_v2  ;;  %v1671_v11 = vld [vmem:[#allocation2 + $0x114] sm:$0xf0]  ;;  %v1148_v16 = vld [vmem:[#allocation2] sm:$0xf]  ;;  %v1157_v17 = vor.u32 %v1639_v8, %v1156_v7 }
  0x1e   :  { %702 = vmatpush.bf16.msra.mxu1 %v1245_v50  ;;  %v1348_v12 = vld [vmem:[#allocation2 + $0x190] sm:$0xf]  ;;  %v1687_v13 = vld [vmem:[#allocation2 + $0x194] sm:$0xf0]  ;;  %v1637_v18 = vld [vmem:[#allocation2 + $0x4] sm:$0xf0]  ;;  %v1285_v21 = vor.u32 %v1671_v11, %v1284_v9 }
  0x1f   :  { %690 = vmatpush.bf16.msra.mxu0 %v1173_v56  ;;  %v1220_v14 = vld [vmem:[#allocation2 + $0x90] sm:$0xf]  ;;  %v1655_v15 = vld [vmem:[#allocation2 + $0x94] sm:$0xf0]  ;;  %v1276_v19 = vld [vmem:[#allocation2 + $0x100] sm:$0xf]  ;;  %v1349_v22 = vor.u32 %v1687_v13, %v1348_v12  ;;  %v1149_v33 = vor.u32 %v1637_v18, %v1148_v16 }
  0x20   :  { %716 = vmatpush.bf16.msra.mxu2 %v1301_v57  ;;  %v1669_v20 = vld [vmem:[#allocation2 + $0x104] sm:$0xf0]  ;;  %v1340_v23 = vld [vmem:[#allocation2 + $0x180] sm:$0xf]  ;;  %v1221_v26 = vor.u32 %v1655_v15, %v1220_v14  ;;  %v1460_v27 = vld [vmem:[#allocation2 + $0x270] sm:$0xf] }
  0x21   :  { %729 = vmatpush.bf16.msra.mxu3 %v1365_v58  ;;  %v1685_v24 = vld [vmem:[#allocation2 + $0x184] sm:$0xf0]  ;;  %v1715_v28 = vld [vmem:[#allocation2 + $0x274] sm:$0xf0]  ;;  %v1650_v29 = vld [vmem:[#allocation2 + $0x74] sm:$0xf]  ;;  %v1277_v38 = vor.u32 %v1669_v20, %v1276_v19 }
  0x22   :  { %703 = vmatpush.bf16.msra.mxu1 %v1237_v62  ;;  %v61_v25 = vld [vmem:[%s1983_s0 + $0x8] sm:$0xff]  ;;  %v1206_v30 = vld [vmem:[#allocation2 + $0x78] sm:$0xf0]  ;;  %v1212_v31 = vld [vmem:[#allocation2 + $0x80] sm:$0xf]  ;;  %v1341_v39 = vor.u32 %v1685_v24, %v1340_v23  ;;  %v1461_v43 = vor.u32 %v1715_v28, %v1460_v27  ;;  %vm682_vm0 = vcmask 130048  }
  0x23   :  { %691 = vmatpush.bf16.msra.mxu0 %v1165_v4  ;;  %v60_v32 = vld [vmem:[%s1983_s0] sm:$0xff]  ;;  %v1653_v34 = vld [vmem:[#allocation2 + $0x84] sm:$0xf0]  ;;  %v174_v35 = vunpack.c.l.b16 %v61_v25  ;;  %v1524_v40 = vld [vmem:[#allocation2 + $0x2f0] sm:$0xf]  ;;  %v1209_v44 = vor.u32 %v1650_v29, %v1206_v30  ;;  %v175_v53 = vunpack.c.h.b16 %v61_v25  ;;  %vm1113_vm1 = vcmask 80896  }
  0x24   :  { %717 = vmatpush.bf16.msra.mxu2 %v1293_v5  ;;  %v1532_v36 = vld [vmem:[#allocation2 + $0x300] sm:$0xf]  ;;  %v1733_v37 = vld [vmem:[#allocation2 + $0x304] sm:$0xf0]  ;;  %v1731_v41 = vld [vmem:[#allocation2 + $0x2f4] sm:$0xf0]  ;;  %v172_v42 = vunpack.c.l.b16 %v60_v32  ;;  %v1213_v48 = vor.u32 %v1653_v34, %v1212_v31  ;;  %v173_v54 = vunpack.c.h.b16 %v60_v32 }
  0x25   :  { %730 = vmatpush.bf16.msra.mxu3 %v1357_v6  ;;  %v1666_v45 = vld [vmem:[#allocation2 + $0xf4] sm:$0xf]  ;;  %v1270_v46 = vld [vmem:[#allocation2 + $0xf8] sm:$0xf0]  ;;  %v1452_v47 = vld [vmem:[#allocation2 + $0x260] sm:$0xf]  ;;  %v1533_v49 = vor.u32 %v1733_v37, %v1532_v36  ;;  %v1908_v55 = vpack.c.b16 %v174_v35, %v174_v35  ;;  %v1525_v56 = vor.u32 %v1731_v41, %v1524_v40  ;;  %v1912_v2 = vpack.c.b16 %v175_v53, %v175_v53 }
  0x26   :  { %704 = vmatpush.bf16.msra.mxu1 %v1229_v10  ;;  %v1713_v50 = vld [vmem:[#allocation2 + $0x264] sm:$0xf0]  ;;  %v1648_v51 = vld [vmem:[#allocation2 + $0x64] sm:$0xf]  ;;  %v1198_v52 = vld [vmem:[#allocation2 + $0x68] sm:$0xf0]  ;;  %v1273_v57 = vor.u32 %v1666_v45, %v1270_v46  ;;  %v1910_v58 = vpack.c.b16 %v172_v42, %v172_v42  ;;  %v1914_v3 = vpack.c.b16 %v173_v54, %v173_v54 }
  0x27   :  { %692 = vmatpush.bf16.msra.mxu0 %v1157_v17  ;;  %v1516_v59 = vld [vmem:[#allocation2 + $0x2e0] sm:$0xf]  ;;  %v1729_v60 = vld [vmem:[#allocation2 + $0x2e4] sm:$0xf0]  ;;  %v1453_v61 = vor.u32 %v1713_v50, %v1452_v47  ;;  %v1201_v62 = vor.u32 %v1648_v51, %v1198_v52  ;;  %v1664_v63 = vld [vmem:[#allocation2 + $0xe4] sm:$0xf] }
  0x28   :  { %718 = vmatpush.bf16.msra.mxu2 %v1285_v21  ;;  %v1262_v0 = vld [vmem:[#allocation2 + $0xe8] sm:$0xf0]  ;;  %v1444_v1 = vld [vmem:[#allocation2 + $0x250] sm:$0xf]  ;;  %v1711_v4 = vld [vmem:[#allocation2 + $0x254] sm:$0xf0]  ;;  %v1517_v7 = vor.u32 %v1729_v60, %v1516_v59 }
  0x29   :  { %731 = vmatpush.bf16.msra.mxu3 %v1349_v22  ;;  %v1646_v5 = vld [vmem:[#allocation2 + $0x54] sm:$0xf]  ;;  %v1190_v6 = vld [vmem:[#allocation2 + $0x58] sm:$0xf0]  ;;  %v1265_v8 = vor.u32 %v1664_v63, %v1262_v0  ;;  %v1508_v9 = vld [vmem:[#allocation2 + $0x2d0] sm:$0xf]  ;;  %v1445_v11 = vor.u32 %v1711_v4, %v1444_v1 }
  0x2a   :  { %705 = vmatpush.bf16.msra.mxu1 %v1221_v26  ;;  %v1727_v10 = vld [vmem:[#allocation2 + $0x2d4] sm:$0xf0]  ;;  %v1193_v12 = vor.u32 %v1646_v5, %v1190_v6  ;;  %v1662_v13 = vld [vmem:[#allocation2 + $0xd4] sm:$0xf]  ;;  %v1254_v14 = vld [vmem:[#allocation2 + $0xd8] sm:$0xf0] }
  0x2b   :  { %693 = vmatpush.bf16.msra.mxu0 %v1149_v33  ;;  %v1436_v15 = vld [vmem:[#allocation2 + $0x240] sm:$0xf]  ;;  %v1709_v16 = vld [vmem:[#allocation2 + $0x244] sm:$0xf0]  ;;  %v1644_v17 = vld [vmem:[#allocation2 + $0x44] sm:$0xf]  ;;  %v1509_v19 = vor.u32 %v1727_v10, %v1508_v9  ;;  %v1257_v20 = vor.u32 %v1662_v13, %v1254_v14 }
  0x2c   :  { %719 = vmatpush.bf16.msra.mxu2 %v1277_v38  ;;  %v1182_v18 = vld [vmem:[#allocation2 + $0x48] sm:$0xf0]  ;;  %v1500_v21 = vld [vmem:[#allocation2 + $0x2c0] sm:$0xf]  ;;  %v1725_v22 = vld [vmem:[#allocation2 + $0x2c4] sm:$0xf0]  ;;  %v1437_v24 = vor.u32 %v1709_v16, %v1436_v15 }
  0x2d   :  { %732 = vmatpush.bf16.msra.mxu3 %v1341_v39  ;;  %v63_v23 = vld [vmem:[%s1983_s0 + $0x18] sm:$0xf]  ;;  %v1185_v25 = vor.u32 %v1644_v17, %v1182_v18  ;;  %v1660_v26 = vld [vmem:[#allocation2 + $0xc4] sm:$0xf]  ;;  %v1246_v27 = vld [vmem:[#allocation2 + $0xc8] sm:$0xf0]  ;;  %v1501_v32 = vor.u32 %v1725_v22, %v1500_v21 }
  0x2e   :  { %706 = vmatpush.bf16.msra.mxu1 %v1213_v48  ;;  %694 = vmatmul.bf16.vlgmr.msra.gmra.mxu0 %v1910_v58  ;;  %v1428_v28 = vld [vmem:[#allocation2 + $0x230] sm:$0xf]  ;;  %v1707_v29 = vld [vmem:[#allocation2 + $0x234] sm:$0xf0]  ;;  %v1642_v30 = vld [vmem:[#allocation2 + $0x34] sm:$0xf]  ;;  %v178_v33 = vunpack.c.l.b16 %v63_v23  ;;  %v1249_v34 = vor.u32 %v1660_v26, %v1246_v27 }
  0x2f   :  { %738 = vmatpush.bf16.msrb.mxu0 %v1461_v43  ;;  %720 = vmatmul.bf16.vlgmr.msra.gmra.mxu2 %v1908_v55  ;;  %v1174_v31 = vld [vmem:[#allocation2 + $0x38] sm:$0xf0]  ;;  %v1492_v35 = vld [vmem:[#allocation2 + $0x2b0] sm:$0xf]  ;;  %v1723_v36 = vld [vmem:[#allocation2 + $0x2b4] sm:$0xf0]  ;;  %v1429_v37 = vor.u32 %v1707_v29, %v1428_v28 }
  0x30   :  { %771 = vmatpush.bf16.msrb.mxu2 %v1533_v49  ;;  %733 = vmatmul.bf16.vlgmr.msra.gmra.mxu3 %v1912_v2  ;;  %v1177_v38 = vor.u32 %v1642_v30, %v1174_v31  ;;  %v1658_v39 = vld [vmem:[#allocation2 + $0xb4] sm:$0xf]  ;;  %v1238_v40 = vld [vmem:[#allocation2 + $0xb8] sm:$0xf0]  ;;  %v1420_v41 = vld [vmem:[#allocation2 + $0x220] sm:$0xf]  ;;  %v1493_v45 = vor.u32 %v1723_v36, %v1492_v35  ;;  %v1923_v46 = vpack.c.b16 %v178_v33, %v178_v33 }
  0x31   :  { %777 = vmatpush.bf16.msrb.mxu3 %v1209_v44  ;;  %707 = vmatmul.bf16.vlgmr.msra.gmra.mxu1 %v1914_v3  ;;  %v1705_v42 = vld [vmem:[#allocation2 + $0x224] sm:$0xf0]  ;;  %v1640_v43 = vld [vmem:[#allocation2 + $0x24] sm:$0xf]  ;;  %v1166_v44 = vld [vmem:[#allocation2 + $0x28] sm:$0xf0]  ;;  %v1241_v47 = vor.u32 %v1658_v39, %v1238_v40 }
  0x32   :  { %751 = vmatpush.bf16.msrb.mxu1 %v1525_v56  ;;  %v1484_v48 = vld [vmem:[#allocation2 + $0x2a0] sm:$0xf]  ;;  %v1721_v49 = vld [vmem:[#allocation2 + $0x2a4] sm:$0xf0]  ;;  %v1421_v50 = vor.u32 %v1705_v42, %v1420_v41  ;;  %v1169_v51 = vor.u32 %v1640_v43, %v1166_v44  ;;  %v1656_v52 = vld [vmem:[#allocation2 + $0xa4] sm:$0xf] }
  0x33   :  { %739 = vmatpush.bf16.msrb.mxu0 %v1453_v61  ;;  %v1230_v53 = vld [vmem:[#allocation2 + $0xa8] sm:$0xf0]  ;;  %v1412_v54 = vld [vmem:[#allocation2 + $0x210] sm:$0xf]  ;;  %v1703_v56 = vld [vmem:[#allocation2 + $0x214] sm:$0xf0]  ;;  %v1485_v60 = vor.u32 %v1721_v49, %v1484_v48 }
  0x34   :  { %790 = vmatpush.bf16.msra.mxu2 %v1273_v57  ;;  %v1638_v57 = vld [vmem:[#allocation2 + $0x14] sm:$0xf]  ;;  %v1158_v59 = vld [vmem:[#allocation2 + $0x18] sm:$0xf0]  ;;  %v1476_v61 = vld [vmem:[#allocation2 + $0x290] sm:$0xf]  ;;  %v1413_v4 = vor.u32 %v1703_v56, %v1412_v54 }
  0x35   :  { %778 = vmatpush.bf16.msrb.mxu3 %v1201_v62  ;;  %v1233_v62 = vor.u32 %v1656_v52, %v1230_v53  ;;  %v1719_v63 = vld [vmem:[#allocation2 + $0x294] sm:$0xf0]  ;;  %v1654_v0 = vld [vmem:[#allocation2 + $0x94] sm:$0xf]  ;;  %v1222_v1 = vld [vmem:[#allocation2 + $0x98] sm:$0xf0]  ;;  %v1161_v5 = vor.u32 %v1638_v57, %v1158_v59 }
  0x36   :  { %752 = vmatpush.bf16.msrb.mxu1 %v1517_v7  ;;  %v1404_v6 = vld [vmem:[#allocation2 + $0x200] sm:$0xf]  ;;  %v1701_v7 = vld [vmem:[#allocation2 + $0x204] sm:$0xf0]  ;;  %v1636_v9 = vld [vmem:[#allocation2 + $0x4] sm:$0xf]  ;;  %v1225_v16 = vor.u32 %v1654_v0, %v1222_v1 }
  0x37   :  { %740 = vmatpush.bf16.msrb.mxu0 %v1445_v11  ;;  %v1150_v10 = vld [vmem:[#allocation2 + $0x8] sm:$0xf0]  ;;  %v1682_v11 = vld [vmem:[#allocation2 + $0x174] sm:$0xf]  ;;  %v1334_v13 = vld [vmem:[#allocation2 + $0x178] sm:$0xf0] }
  0x38   :  { %791 = vmatpush.bf16.msra.mxu2 %v1265_v8  ;;  %v62_v8 = vld [vmem:[%s1983_s0 + $0x10] sm:$0xff]  ;;  %v1462_v15 = vld [vmem:[#allocation2 + $0x278] sm:$0xf0]  ;;  %v1468_v17 = vld [vmem:[#allocation2 + $0x280] sm:$0xf]  ;;  %v1153_v21 = vor.u32 %v1636_v9, %v1150_v10  ;;  %s1135_s17 = sshll.u32 %s1990_s7, 4  ;;  %s1136_s17 = int_to_ptr.hbm [resolvable:$true] %s1135_s17 }
  0x39   :  { %779 = vmatpush.bf16.msrb.mxu3 %v1193_v12  ;;  %v1477_v12 = vor.u32 %v1719_v63, %v1476_v61  ;;  %v1714_v14 = vld [vmem:[#allocation2 + $0x274] sm:$0xf]  ;;  %v1717_v18 = vld [vmem:[#allocation2 + $0x284] sm:$0xf0]  ;;  %v1652_v22 = vld [vmem:[#allocation2 + $0x84] sm:$0xf]  ;;  %v177_v30 = vunpack.c.h.b16 %v62_v8 }
  0x3a   :  { %753 = vmatpush.bf16.msrb.mxu1 %v1509_v19  ;;  %v176_v19 = vunpack.c.l.b16 %v62_v8  ;;  %v1214_v23 = vld [vmem:[#allocation2 + $0x88] sm:$0xf0]  ;;  %v1465_v26 = vor.u32 %v1714_v14, %v1462_v15  ;;  %v1398_v27 = vld [vmem:[#allocation2 + $0x1f8] sm:$0xf0]  ;;  %v1730_v28 = vld [vmem:[#allocation2 + $0x2f4] sm:$0xf]  ;;  %v1469_v31 = vor.u32 %v1717_v18, %v1468_v17 }
  0x3b   :  { %741 = vmatpush.bf16.msrb.mxu0 %v1437_v24  ;;  %v1698_v24 = vld [vmem:[#allocation2 + $0x1f4] sm:$0xf]  ;;  %v1526_v29 = vld [vmem:[#allocation2 + $0x2f8] sm:$0xf0]  ;;  %v1326_v33 = vld [vmem:[#allocation2 + $0x168] sm:$0xf0]  ;;  %v1217_v35 = vor.u32 %v1652_v22, %v1214_v23  ;;  %v1932_v41 = vpack.c.b16 %v177_v30, %v177_v30 }
  0x3c   :  { %792 = vmatpush.bf16.msra.mxu2 %v1257_v20  ;;  %v1405_v20 = vor.u32 %v1701_v7, %v1404_v6  ;;  %v1712_v36 = vld [vmem:[#allocation2 + $0x264] sm:$0xf]  ;;  %v1529_v39 = vor.u32 %v1730_v28, %v1526_v29  ;;  %v1390_v43 = vld [vmem:[#allocation2 + $0x1e8] sm:$0xf0]  ;;  %v1678_v48 = vld [vmem:[#allocation2 + $0x154] sm:$0xf] }
  0x3d   :  { %780 = vmatpush.bf16.msrb.mxu3 %v1185_v25  ;;  %v1337_v25 = vor.u32 %v1682_v11, %v1334_v13  ;;  %v1696_v40 = vld [vmem:[#allocation2 + $0x1e4] sm:$0xf]  ;;  %v1318_v49 = vld [vmem:[#allocation2 + $0x158] sm:$0xf0]  ;;  %v1694_v54 = vld [vmem:[#allocation2 + $0x1d4] sm:$0xf] }
  0x3e   :  { %754 = vmatpush.bf16.msrb.mxu1 %v1501_v32  ;;  %v1680_v32 = vld [vmem:[#allocation2 + $0x164] sm:$0xf]  ;;  %v1393_v52 = vor.u32 %v1696_v40, %v1390_v43  ;;  %v1382_v56 = vld [vmem:[#allocation2 + $0x1d8] sm:$0xf0]  ;;  %v1321_v57 = vor.u32 %v1678_v48, %v1318_v49  ;;  %v1726_v59 = vld [vmem:[#allocation2 + $0x2d4] sm:$0xf] }
  0x3f   :  { %742 = vmatpush.bf16.msrb.mxu0 %v1429_v37  ;;  %1538 = vmatmul.msk.bf16.vlgmr.msrb.gmra.mxu2 %vm682_vm0, %v1923_v46  ;;  %v1454_v37 = vld [vmem:[#allocation2 + $0x268] sm:$0xf0]  ;;  %v1329_v42 = vor.u32 %v1680_v32, %v1326_v33  ;;  %v1728_v44 = vld [vmem:[#allocation2 + $0x2e4] sm:$0xf]  ;;  %v1706_v13 = vld [vmem:[#allocation2 + $0x234] sm:$0xf] }
  0x40   :  { %793 = vmatpush.bf16.msra.mxu2 %v1249_v34  ;;  %v1930_v34 = vpack.c.b16 %v176_v19, %v176_v19  ;;  %v1310_v63 = vld [vmem:[#allocation2 + $0x148] sm:$0xf0]  ;;  %v1708_v0 = vld [vmem:[#allocation2 + $0x244] sm:$0xf]  ;;  %v1430_v14 = vld [vmem:[#allocation2 + $0x238] sm:$0xf0] }
  0x41   :  { %781 = vmatpush.bf16.msrb.mxu3 %v1177_v38  ;;  %v1401_v38 = vor.u32 %v1698_v24, %v1398_v27  ;;  %v1438_v1 = vld [vmem:[#allocation2 + $0x248] sm:$0xf0]  ;;  %v1692_v6 = vld [vmem:[#allocation2 + $0x1c4] sm:$0xf]  ;;  %v1366_v18 = vld [vmem:[#allocation2 + $0x1b8] sm:$0xf0] }
  0x42   :  { %755 = vmatpush.bf16.msrb.mxu1 %v1493_v45  ;;  %v1518_v45 = vld [vmem:[#allocation2 + $0x2e8] sm:$0xf0]  ;;  %v1724_v9 = vld [vmem:[#allocation2 + $0x2c4] sm:$0xf]  ;;  %v1441_v11 = vor.u32 %v1708_v0, %v1438_v1  ;;  %v1722_v19 = vld [vmem:[#allocation2 + $0x2b4] sm:$0xf] }
  0x43   :  { %743 = vmatpush.bf16.msrb.mxu0 %v1421_v50  ;;  %v1710_v50 = vld [vmem:[#allocation2 + $0x254] sm:$0xf]  ;;  %v1521_v53 = vor.u32 %v1728_v44, %v1518_v45  ;;  %v1374_v8 = vld [vmem:[#allocation2 + $0x1c8] sm:$0xf0]  ;;  %v1672_v22 = vld [vmem:[#allocation2 + $0x124] sm:$0xf] }
  0x44   :  { %794 = vmatpush.bf16.msra.mxu2 %v1241_v47  ;;  %v1457_v47 = vor.u32 %v1712_v36, %v1454_v37  ;;  %v1502_v10 = vld [vmem:[#allocation2 + $0x2c8] sm:$0xf0]  ;;  %v1377_v15 = vor.u32 %v1692_v6, %v1374_v8  ;;  %v1704_v24 = vld [vmem:[#allocation2 + $0x224] sm:$0xf]  ;;  %v1286_v36 = vld [vmem:[#allocation2 + $0x118] sm:$0xf0] }
  0x45   :  { %782 = vmatpush.bf16.msrb.mxu3 %v1169_v51  ;;  %v1446_v51 = vld [vmem:[#allocation2 + $0x258] sm:$0xf0]  ;;  %v1294_v23 = vld [vmem:[#allocation2 + $0x128] sm:$0xf0]  ;;  %v1688_v28 = vld [vmem:[#allocation2 + $0x1a4] sm:$0xf] }
  0x46   :  { %756 = vmatpush.bf16.msrb.mxu1 %v1485_v60  ;;  %v1510_v60 = vld [vmem:[#allocation2 + $0x2d8] sm:$0xf0]  ;;  %v1449_v61 = vor.u32 %v1710_v50, %v1446_v51  ;;  %v1297_v29 = vor.u32 %v1672_v22, %v1294_v23  ;;  %v1358_v30 = vld [vmem:[#allocation2 + $0x1a8] sm:$0xf0]  ;;  %v1702_v37 = vld [vmem:[#allocation2 + $0x214] sm:$0xf] }
  0x47   :  { %744 = vmatpush.bf16.msrb.mxu0 %v1413_v4  ;;  %v1385_v4 = vor.u32 %v1694_v54, %v1382_v56  ;;  %v1486_v32 = vld [vmem:[#allocation2 + $0x2a8] sm:$0xf0]  ;;  %v1350_v44 = vld [vmem:[#allocation2 + $0x198] sm:$0xf0]  ;;  %v1718_v45 = vld [vmem:[#allocation2 + $0x294] sm:$0xf] }
  0x48   :  { %795 = vmatpush.bf16.msra.mxu2 %v1233_v62  ;;  %v1676_v62 = vld [vmem:[#allocation2 + $0x144] sm:$0xf]  ;;  %v1278_v50 = vld [vmem:[#allocation2 + $0x108] sm:$0xf0]  ;;  %v1739_v8 = vld [vmem:[#allocation5 + $0x28] sm:$0xff] }
  0x49   :  { %783 = vmatpush.bf16.msrb.mxu3 %v1161_v5  ;;  %v1513_v5 = vor.u32 %v1726_v59, %v1510_v60  ;;  %v1313_v7 = vor.u32 %v1676_v62, %v1310_v63  ;;  %v1668_v49 = vld [vmem:[#allocation2 + $0x104] sm:$0xf]  ;;  %v1342_v59 = vld [vmem:[#allocation2 + $0x188] sm:$0xf0] }
  0x4a   :  { %757 = vmatpush.bf16.msrb.mxu1 %v1477_v12  ;;  %v1674_v12 = vld [vmem:[#allocation2 + $0x134] sm:$0xf]  ;;  %v1700_v51 = vld [vmem:[#allocation2 + $0x204] sm:$0xf]  ;;  %v1281_v56 = vor.u32 %v1668_v49, %v1278_v50  ;;  %v1470_v62 = vld [vmem:[#allocation2 + $0x288] sm:$0xf0] }
  0x4b   :  { %745 = vmatpush.bf16.msrb.mxu0 %v1405_v20  ;;  %v1494_v20 = vld [vmem:[#allocation2 + $0x2b8] sm:$0xf0]  ;;  %v1732_v63 = vld [vmem:[#allocation2 + $0x304] sm:$0xf]  ;;  %v1534_v0 = vld [vmem:[#allocation2 + $0x308] sm:$0xf0] }
  0x4c   :  { %796 = vmatpush.bf16.msra.mxu2 %v1225_v16  ;;  %v1690_v16 = vld [vmem:[#allocation2 + $0x1b4] sm:$0xf]  ;;  %v1497_v27 = vor.u32 %v1722_v19, %v1494_v20  ;;  %v1741_v6 = vld [vmem:[#allocation5 + $0x38] sm:$0xff] }
  0x4d   :  { %784 = vmatpush.bf16.msrb.mxu3 %v1153_v21  ;;  %v1433_v21 = vor.u32 %v1706_v13, %v1430_v14 }
  0x4e   :  { %758 = vmatpush.bf16.msrb.mxu1 %v1469_v31  ;;  %746 = vmatmul.bf16.vlgmr.msrb.gmra.mxu0 %v1930_v34  ;;  %v1720_v31 = vld [vmem:[#allocation2 + $0x2a4] sm:$0xf] }
  0x4f   :  { %803 = vmatpush.bf16.msra.mxu0 %v1337_v25  ;;  %v1422_v25 = vld [vmem:[#allocation2 + $0x228] sm:$0xf0]  ;;  %v1489_v40 = vor.u32 %v1720_v31, %v1486_v32 }
  0x50   :  { %797 = vmatpush.bf16.msra.mxu2 %v1217_v35  ;;  %785 = vmatmul.bf16.vlgmr.msrb.gmra.mxu3 %v1910_v58  ;;  %v1505_v58 = vor.u32 %v1724_v9, %v1502_v10  ;;  %v1425_v33 = vor.u32 %v1704_v24, %v1422_v25  ;;  %v1670_v35 = vld [vmem:[#allocation2 + $0x114] sm:$0xf]  ;;  %v1735_v10 = vld [vmem:[#allocation5 + $0x8] sm:$0xff] }
  0x51   :  { %829 = vmatpush.bf16.msra.mxu3 %v1465_v26  ;;  %759 = vmatmul.bf16.vlgmr.msrb.gmra.mxu1 %v1932_v41  ;;  %v1369_v26 = vor.u32 %v1690_v16, %v1366_v18  ;;  %v1289_v43 = vor.u32 %v1670_v35, %v1286_v36  ;;  %v1738_v9 = vld [vmem:[#allocation5 + $0x20] sm:$0xff] }
  0x52   :  { %816 = vmatpush.bf16.msra.mxu1 %v1401_v38  ;;  %v1414_v38 = vld [vmem:[#allocation2 + $0x218] sm:$0xf0] }
  0x53   :  { %804 = vmatpush.bf16.msra.mxu0 %v1329_v42  ;;  %798 = vmatmul.bf16.vlgmr.msra.gmra.mxu2 %v1914_v3  ;;  %v1302_v3 = vld [vmem:[#allocation2 + $0x138] sm:$0xf0]  ;;  %v1686_v42 = vld [vmem:[#allocation2 + $0x194] sm:$0xf]  ;;  %v1417_v48 = vor.u32 %v1702_v37, %v1414_v38 }
  0x54   :  { %842 = vmatpush.bf16.msrb.mxu2 %v1529_v39  ;;  %v1305_v17 = vor.u32 %v1674_v12, %v1302_v3  ;;  %v1361_v39 = vor.u32 %v1688_v28, %v1358_v30  ;;  %v1747_v30 = vld [vmem:[#allocation5 + $0x68] sm:$0xff] }
  0x55   :  { %830 = vmatpush.bf16.msra.mxu3 %v1457_v47  ;;  %v1478_v47 = vld [vmem:[#allocation2 + $0x298] sm:$0xf0] }
  0x56   :  { %817 = vmatpush.bf16.msra.mxu1 %v1393_v52  ;;  %v1406_v52 = vld [vmem:[#allocation2 + $0x208] sm:$0xf0]  ;;  %v1481_v54 = vor.u32 %v1718_v45, %v1478_v47  ;;  %v1742_v45 = vld [vmem:[#allocation5 + $0x40] sm:$0xff] }
  0x57   :  { %805 = vmatpush.bf16.msra.mxu0 %v1321_v57  ;;  %v1684_v57 = vld [vmem:[#allocation2 + $0x184] sm:$0xf]  ;;  %v1409_v60 = vor.u32 %v1700_v51, %v1406_v52 }
  0x58   :  { %843 = vmatpush.bf16.msrb.mxu2 %v1521_v53  ;;  %v1353_v53 = vor.u32 %v1686_v42, %v1350_v44  ;;  %v1345_v1 = vor.u32 %v1684_v57, %v1342_v59  ;;  %v1743_v44 = vld [vmem:[#allocation5 + $0x48] sm:$0xff] }
  0x59   :  { %831 = vmatpush.bf16.msra.mxu3 %v1449_v61  ;;  %v1716_v61 = vld [vmem:[#allocation2 + $0x284] sm:$0xf] }
  0x5a   :  { %818 = vmatpush.bf16.msra.mxu1 %v1385_v4  ;;  %v1473_v4 = vor.u32 %v1716_v61, %v1470_v62 }
  0x5b   :  { %806 = vmatpush.bf16.msra.mxu0 %v1313_v7  ;;  %v1740_v7 = vld [vmem:[#allocation5 + $0x30] sm:$0xff] }
  0x5c   :  { %844 = vmatpush.bf16.msrb.mxu2 %v1513_v5  ;;  %v1537_v5 = vor.u32 %v1732_v63, %v1534_v0 }
  0x5d   :  { %832 = vmatpush.bf16.msra.mxu3 %v1441_v11 }
  0x5e   :  { %819 = vmatpush.bf16.msra.mxu1 %v1377_v15 }
  0x5f   :  { %807 = vmatpush.bf16.msra.mxu0 %v1305_v17 }
  0x60   :  { %845 = vmatpush.bf16.msrb.mxu2 %v1505_v58 }
  0x61   :  { %833 = vmatpush.bf16.msra.mxu3 %v1433_v21  ;;  %v1749_v21 = vld [vmem:[#allocation5 + $0x78] sm:$0xff] }
  0x62   :  { %820 = vmatpush.bf16.msra.mxu1 %v1369_v26  ;;  %v1748_v26 = vld [vmem:[#allocation5 + $0x70] sm:$0xff] }
  0x63   :  { %808 = vmatpush.bf16.msra.mxu0 %v1297_v29 }
  0x64   :  { %846 = vmatpush.bf16.msrb.mxu2 %v1497_v27 }
  0x65   :  { %834 = vmatpush.bf16.msra.mxu3 %v1425_v33  ;;  %v1746_v33 = vld [vmem:[#allocation5 + $0x60] sm:$0xff] }
  0x66   :  { %821 = vmatpush.bf16.msra.mxu1 %v1361_v39  ;;  %v1745_v39 = vld [vmem:[#allocation5 + $0x58] sm:$0xff] }
  0x67   :  { %809 = vmatpush.bf16.msra.mxu0 %v1289_v43 }
  0x68   :  { %847 = vmatpush.bf16.msrb.mxu2 %v1489_v40  ;;  %v1744_v40 = vld [vmem:[#allocation5 + $0x50] sm:$0xff] }
  0x69   :  { %835 = vmatpush.bf16.msra.mxu3 %v1417_v48 }
  0x6a   :  { %822 = vmatpush.bf16.msra.mxu1 %v1353_v53 }
  0x6b   :  { %810 = vmatpush.bf16.msra.mxu0 %v1281_v56 }
  0x6c   :  { %848 = vmatpush.bf16.msrb.mxu2 %v1481_v54 }
  0x6d   :  { %836 = vmatpush.bf16.msra.mxu3 %v1409_v60 }
  0x6e   :  { %823 = vmatpush.bf16.msra.mxu1 %v1345_v1  ;;  %811 = vmatmul.bf16.vlgmr.msra.gmra.mxu0 %v1908_v55  ;;  %v1737_v55 = vld [vmem:[#allocation5 + $0x18] sm:$0xff] }
  0x70   :  { %837 = vmatmul.bf16.vlgmr.msra.gmra.mxu3 %v1930_v34  ;;  %849 = vmatpush.bf16.msrb.mxu2 %v1473_v4  ;;  %v1736_v34 = vld [vmem:[#allocation5 + $0x10] sm:$0xff] }
  0x71   :  { %824 = vmatmul.bf16.vlgmr.msra.gmra.mxu1 %v1912_v2  ;;  %1017 = vmatpush.bf16.msrb.mxu3 %v1749_v21 }
  0x72   :  { %1004 = vmatpush.bf16.msrb.mxu1 %v1741_v6 }
  0x73   :  { %850 = vmatmul.bf16.vlgmr.msrb.gmra.mxu2 %v1932_v41  ;;  %v1734_v41 = vld [vmem:[#allocation5] sm:$0xff] }
  0x74   :  { %862 = vmatpush.bf16.msra.mxu2 %v1537_v5 }
  0x75   :  { %1018 = vmatpush.bf16.msrb.mxu3 %v1748_v26 }
  0x76   :  { %1005 = vmatpush.bf16.msrb.mxu1 %v1740_v7  ;;  %v1757_v7 = vld [vmem:[%s1988_s5 + $0x38] sm:$0xff] }
  0x77   :  { %1100 = vmatpush.bf16.msrb.mxu0 %v1757_v7 }
  0x79   :  { %1019 = vmatpush.bf16.msrb.mxu3 %v1747_v30 }
  0x7a   :  { %1006 = vmatpush.bf16.msrb.mxu1 %v1739_v8  ;;  %v1756_v8 = vld [vmem:[%s1988_s5 + $0x30] sm:$0xff] }
  0x7b   :  { %1101 = vmatpush.bf16.msrb.mxu0 %v1756_v8 }
  0x7d   :  { %1020 = vmatpush.bf16.msrb.mxu3 %v1746_v33 }
  0x7e   :  { %1007 = vmatpush.bf16.msrb.mxu1 %v1738_v9  ;;  %v1755_v9 = vld [vmem:[%s1988_s5 + $0x28] sm:$0xff] }
  0x7f   :  { %1102 = vmatpush.bf16.msrb.mxu0 %v1755_v9 }
  0x81   :  { %1021 = vmatpush.bf16.msrb.mxu3 %v1745_v39 }
  0x82   :  { %1008 = vmatpush.bf16.msrb.mxu1 %v1737_v55  ;;  %v1754_v55 = vld [vmem:[%s1988_s5 + $0x20] sm:$0xff] }
  0x83   :  { %1539 = vmatmul.msk.bf16.vlgmr.msra.gmra.mxu2 %vm682_vm0, %v1923_v46  ;;  %v162_v46 = vld [vmem:[%s1985_s2] sm:$0x3]  ;;  %1103 = vmatpush.bf16.msrb.mxu0 %v1754_v55 }
  0x84   :  { %v164_v15 = vperm.slane %v162_v46, 0  ;;  %v165_v49 = vperm.slane %v162_v46, 1  ;;  %v1765_v46 = vld [vmem:[%s1987_s4] ss:$0 sm:$0xff]  ;;  %s1855_s4 = smov [#allocation7]  }
  0x85   :  { %1022 = vmatpush.bf16.msrb.mxu3 %v1744_v40 }
  0x86   :  { %1009 = vmatpush.bf16.msrb.mxu1 %v1736_v34  ;;  %v1753_v34 = vld [vmem:[%s1988_s5 + $0x18] sm:$0xff] }
  0x87   :  { %1104 = vmatpush.bf16.msrb.mxu0 %v1753_v34 }
  0x89   :  { %1023 = vmatpush.bf16.msrb.mxu3 %v1743_v44 }
  0x8a   :  { %1010 = vmatpush.bf16.msrb.mxu1 %v1735_v10  ;;  %v1752_v10 = vld [vmem:[%s1988_s5 + $0x10] sm:$0xff] }
  0x8b   :  { %1105 = vmatpush.bf16.msrb.mxu0 %v1752_v10 }
  0x8d   :  { %1024 = vmatpush.bf16.msrb.mxu3 %v1742_v45 }
  0x8e   :  { %1011 = vmatpush.bf16.msrb.mxu1 %v1734_v41  ;;  %v1751_v41 = vld [vmem:[%s1988_s5 + $0x8] sm:$0xff] }
  0x8f   :  { %1106 = vmatpush.bf16.msrb.mxu0 %v1751_v41 }
  0xab   :  { %v695_v11 = vpop.f32.mrf.mxu0 }
  0xac   :  { %v696_v16 = vadd.f32 %v695_v11, %v164_v15 }
  0xae   :  { %v708_v2 = vpop.f32.mrf.mxu1 }
  0xaf   :  { %v709_v18 = vadd.f32 %v708_v2, %v696_v16 }
  0xb2   :  { %v721_v12 = vpop.f32.mrf.mxu2 }
  0xb3   :  { %v734_v3 = vpop.f32.mrf.mxu3  ;;  %v697_v13 = vpop.f32.mrf.mxu0  ;;  %v722_v20 = vadd.f32 %v721_v12, %v709_v18  ;;  %v1750_v12 = vld [vmem:[%s1988_s5] sm:$0xff]  ;;  %s1133_s5 = sshll.u32 %s1855_s4, 4  ;;  %s1134_s5 = int_to_ptr.vmem [resolvable:$true] %s1133_s5 }
  0xb4   :  { %1107 = vmatpush.bf16.msrb.mxu0 %v1750_v12 }
  0xb5   :  { %v735_v22 = vadd.f32 %v734_v3, %v722_v20 }
  0xb6   :  { %v710_v14 = vpop.f32.mrf.mxu1 }
  0xba   :  { %v723_v58 = vpop.f32.mrf.mxu2 }
  0xbb   :  { %v736_v17 = vpop.f32.mrf.mxu3 }
  0xbc   :  { %v1766_v17 = vld [vmem:[%s1989_s6] ss:$0 sm:$0xff] }
  0xc2   :  { %v773_v19 = vpop.f32.mrf.mxu2 }
  0xca   :  { %v775_v25 = vpop.f32.mrf.mxu2 }
  0xcb   :  { %v747_v23 = vpop.f32.mrf.mxu0 }
  0xcc   :  { %v748_v24 = vadd.f32 %v747_v23, %v735_v22 }
  0xce   :  { %v760_v27 = vpop.f32.mrf.mxu1 }
  0xcf   :  { %v761_v28 = vadd.f32 %v760_v27, %v748_v24 }
  0xd1   :  { %v774_v29 = vadd.f32 %v773_v19, %v761_v28 }
  0xd3   :  { %v868_v31 = vmax.f32 %v774_v29, 0.0  ;;  %v749_v32 = vpop.f32.mrf.mxu0  ;;  %v786_v37 = vpop.f32.mrf.mxu3 }
  0xd4   :  { %v787_v52 = vadd.f32 %v786_v37, %v165_v49 }
  0xd5   :  { %v870_v35 = vpack.c.bf16 %v868_v31, %v868_v31 }
  0xd6   :  { %v799_v36 = vpop.f32.mrf.mxu2  ;;  %v762_v38 = vpop.f32.mrf.mxu1 }
  0xd7   :  { %1012 = vmatmul.bf16.vlgmr.msrb.gmra.mxu1 %v870_v35  ;;  %v800_v56 = vadd.f32 %v799_v36, %v787_v52 }
  0xdb   :  { %v788_v43 = vpop.f32.mrf.mxu3 }
  0xde   :  { %v801_v42 = vpop.f32.mrf.mxu2 }
  0xeb   :  { %v812_v47 = vpop.f32.mrf.mxu0 }
  0xec   :  { %v813_v57 = vadd.f32 %v812_v47, %v800_v56 }
  0xee   :  { %v825_v48 = vpop.f32.mrf.mxu1 }
  0xef   :  { %v826_v61 = vadd.f32 %v825_v48, %v813_v57 }
  0xf3   :  { %v838_v50 = vpop.f32.mrf.mxu3  ;;  %v814_v51 = vpop.f32.mrf.mxu0 }
  0xf4   :  { %v839_v62 = vadd.f32 %v838_v50, %v826_v61 }
  0xf6   :  { %v851_v53 = vpop.f32.mrf.mxu2  ;;  %v827_v54 = vpop.f32.mrf.mxu1 }
  0xf7   :  { %v852_v63 = vadd.f32 %v851_v53, %v839_v62 }
  0xfb   :  { %v840_v59 = vpop.f32.mrf.mxu3 }
  0xfe   :  { %v853_v60 = vpop.f32.mrf.mxu2 }
 0x106   :  { %v864_v0 = vpop.f32.mrf.mxu2 }
 0x107   :  { %v865_v1 = vadd.f32 %v864_v0, %v852_v63 }
 0x109   :  { %v869_v4 = vmax.f32 %v865_v1, 0.0 }
 0x10b   :  { %v871_v5 = vpack.c.bf16 %v869_v4, %v869_v4 }
 0x10d   :  { %1025 = vmatmul.bf16.vlgmr.msrb.gmra.mxu3 %v871_v5 }
 0x10e   :  { %v866_v6 = vpop.f32.mrf.mxu2 }
 0x154   :  { %v1013_v11 = vpop.f32.mrf.mxu1 }
 0x155   :  { %v1014_v3 = vadd.f32 %v1765_v46, %v1013_v11 }
 0x15c   :  { %v1015_v2 = vpop.f32.mrf.mxu1 }
 0x190   :  { %v1026_v13 = vpop.f32.mrf.mxu3 }
 0x191   :  { %v1027_v14 = vadd.f32 %v1026_v13, %v1014_v3 }
 0x193   :  { %v1030_v15 = vmax.f32 %v1027_v14, 0.0 }
 0x195   :  { %v1031_v58 = vpack.c.bf16 %v1030_v15, %v1030_v15 }
 0x197   :  { %1108 = vmatmul.bf16.vlgmr.msrb.gmra.mxu0 %v1031_v58 }
 0x198   :  { %v1028_v16 = vpop.f32.mrf.mxu3 }
 0x214   :  { %v1109_v18 = vpop.f32.mrf.mxu0 }
 0x215   :  { %v1110_v19 = vadd.f32 %v1766_v17, %v1109_v18 }
 0x217   :  { %v1114_v20 = vsel %vm1113_vm1, %v1110_v19, -inf }
 0x218   :  { %1115 = vmax.xlane.f32.xlu0 %v1114_v20 }
 0x21c   :  { %v1111_v21 = vpop.f32.mrf.mxu0 }
 0x28b   :  { %v1116_v22 = vpop.xlane.xlu0 %1115 }
 0x28c   :  { %v1117_v23 = vsub.f32 %v1110_v19, %v1116_v22 }
 0x28e   :  { %v1118_v24 = vmul.f32 1.442695, %v1117_v23 }
 0x290   :  { %1767 = vpow2.f32 %v1118_v24 }
 0x296   :  { %v1768_v25 = vpop.eup %1767 }
 0x297   :  { %v1120_v26 = vsel %vm1113_vm1, %v1768_v25, 0.0 }
 0x298   :  { %1121 = vadd.xlane.f32.xlu0 %v1120_v26 }
 0x30b   :  { %v1122_v27 = vpop.xlane.xlu0 %1121 }
 0x30c   :  { %1769 = vlog2.f32 %v1122_v27 }
 0x312   :  { %v1770_v28 = vpop.eup %1769 }
 0x313   :  { %v1124_v29 = vmul.f32 0.6931472, %v1770_v28 }
 0x315   :  { %v1125_v30 = vadd.f32 %v1124_v29, %v1116_v22 }
 0x317   :  { %v1126_v31 = vsub.f32 %v1110_v19, %v1125_v30 }
 0x319   :  { %1127 = vst.msk [vmem:[#allocation7] sm:$0xff] %vm1113_vm1, %v1126_v31 }
 0x31a   :  { %1138 = dma.vmem_to_hbm [thread:$0]  %s1134_s5, 128, %s1136_s17, [#allocation4]  }
 0x31b   :  { %1847 = dma.done.wait [#allocation4], 128  }
 0x31c   :  { %1848 = vsyncadd [#allocation4], 4294967168 }
 0x31d   :  { %1143 = vsyncpa [#allocation3], 1 }
 0x31e   :  { %1144 = vsyncpa [#allocation6], 1 }
 0x31f   :  { %1145 = vsyncpa [#allocation4], 1 }

</bundles_post_ra>
